<compile_context>
chip_gen: v7x
topology: tpu7x:2x2x1
jax: 0.10.0
libtpu: 0.0.40
codegen_flags: <defaults>
</compile_context>

<pallas_src>
import functools

import numpy as np
import jax
import jax.numpy as jnp
from jax.experimental import pallas as pl
from jax.experimental.pallas import tpu as pltpu


# ---------------------------------------------------------------------------
# Deterministic weight init (mirror of MDCT_syn_init, nCh = 1)
# ---------------------------------------------------------------------------
def mdct_syn_init(N, filtlen):
    n = np.arange(filtlen)
    k = np.arange(N)[:, None]
    win = np.sin(np.pi / filtlen * (n + 0.5))
    w = (win[None, :]
         * np.sqrt(2.0 / N)
         * np.cos(np.pi / N * (k + 0.5) * (n[None, :] + 0.5 - N / 2)))
    # ConvTranspose2d weight layout: (in_channels=N, out_channels=1, filtlen, 1)
    return jnp.asarray(w[:, None, :, None], dtype=jnp.float32)


# ---------------------------------------------------------------------------
# Helpers
# ---------------------------------------------------------------------------
def _round_up(a, b):
    return -(-a // b) * b


def _vmem_budget_bytes():
    """Generation-aware (tile budget, scoped-VMEM limit) in bytes."""
    cap = 128 * 1024 * 1024
    try:
        cap = int(getattr(pltpu.get_tpu_info(), "vmem_capacity_bytes", cap))
    except Exception:
        pass
    if cap <= 64 * 1024 * 1024:
        # v7x-class: 64 MiB per TensorCore -> smaller tiles, keep 2x buffering.
        return 24 * 1024 * 1024, 52 * 1024 * 1024
    # v5e / v6e: 128 MiB physical VMEM.
    return 48 * 1024 * 1024, 100 * 1024 * 1024


def _choose_tile_rows(M, S, N, q, budget, in_itemsize):
    """Rows (of B*W) per grid step.

    Sized against a generation-aware VMEM budget (double-buffered bf16 input
    tile + double-buffered f32 output tile + f32 matmul/overlap-add
    intermediates, with S already sublane-padded), then capped so the grid has
    >= 4 (or >= 2) steps when M allows it (megacore on v7x + pipelining).
    """
    bytes_per_row = S * N * (2 * in_itemsize + 20 + 4 * q)
    t = max(1, int(budget // max(bytes_per_row, 1)))
    if M >= 4:
        t = min(t, max(1, M // 4))
    elif M >= 2:
        t = min(t, max(1, M // 2))
    return min(t, M)


# ---------------------------------------------------------------------------
# Pallas kernel: one batched matmul + roll-based overlap-add, single store
# ---------------------------------------------------------------------------
def mdct_syn_kernel(x_ref, w_ref, o_ref, *, S, N, q):
    # x_ref: (tile_m*S, N) compute dtype, w_ref: (N, q*N) compute dtype,
    # o_ref: (tile_m, S, N) float32.
    tile_m = o_ref.shape[0]

    # Single MXU matmul over all (row, frame) pairs in this tile; f32 accum.
    frames = jnp.dot(x_ref[...], w_ref[...],
                     preferred_element_type=jnp.float32)      # (tile_m*S, q*N)
    frames = frames.reshape(tile_m, S, q * N)                 # S multiple of 8

    # Overlap-add with hop N, built as a value: frame t, sub-segment j lands
    # on output segment t + j.  Each row has >= q-1 trailing all-zero frames,
    # so a circular sublane roll wraps only zeros to the front -> no masking.
    out = frames[:, :, :N]
    for j in range(1, q):
        out = out + pltpu.roll(frames[:, :, j * N:(j + 1) * N],
                               shift=j, axis=1)
    # ONE aligned full-block store (no zero-init, no read-modify-write).
    o_ref[...] = out


def mdct_syn_stereo(x, weight, *, tile_rows=None, compute_dtype=jnp.bfloat16):
    """x: (B, N, T, W) float32, weight: (N, 1, filtlen, 1) float32 ->
    (B, 1, (T-1)*N + filtlen, W) float32, matching nn.ConvTranspose2d.

    compute_dtype controls the MXU input precision (bfloat16 by default;
    pass jnp.float32 for bit-closer results at lower throughput)."""
    B, N, T, W = x.shape
    filtlen = weight.shape[2]
    L = (T - 1) * N + filtlen
    q = -(-filtlen // N)                  # ceil(filtlen / N); == 2 for MDCT
    Kw = q * N

    # Weight as (N, q*N), zero-padded past filtlen (pad contributes zeros).
    wmat = jnp.zeros((N, Kw), jnp.float32).at[:, :filtlen].set(
        weight[:, 0, :, 0].astype(jnp.float32)).astype(compute_dtype)

    M = B * W
    # Frames per row, padded so it covers all T+q-1 output segments AND is a
    # multiple of 8 (sublane-aligned matmul reshape, rolls and stores).
    S = _round_up(T + q - 1, 8)

    in_itemsize = np.dtype(compute_dtype).itemsize
    budget, vmem_limit = _vmem_budget_bytes()
    if tile_rows is not None:
        if int(tile_rows) < 1:
            raise ValueError("tile_rows must be a positive integer")
        tile_m = int(tile_rows)
    else:
        tile_m = _choose_tile_rows(M, S, N, q, budget, in_itemsize)
    M_pad = _round_up(M, tile_m)

    # Layout glue: (B, N, T, W) -> (B*W, T, N): spectral bins on lanes.
    # Row / frame zero-padding only produces zero output and is sliced off.
    x_k = jnp.transpose(x.astype(jnp.float32), (0, 3, 2, 1)).reshape(M, T, N)
    x_k = jnp.pad(x_k, ((0, M_pad - M), (0, S - T), (0, 0)))
    x2 = x_k.reshape(M_pad * S, N).astype(compute_dtype)

    grid = (M_pad // tile_m,)
    out3 = pl.pallas_call(
        functools.partial(mdct_syn_kernel, S=S, N=N, q=q),
        out_shape=jax.ShapeDtypeStruct((M_pad, S, N), jnp.float32),
        grid=grid,
        in_specs=[
            pl.BlockSpec((tile_m * S, N), lambda i: (i, 0)),
            pl.BlockSpec((N, Kw), lambda i: (0, 0)),        # weight: resident
        ],
        out_specs=pl.BlockSpec((tile_m, S, N), lambda i: (i, 0, 0)),
        compiler_params=pltpu.CompilerParams(
            dimension_semantics=("parallel",),
            vmem_limit_bytes=vmem_limit),
    )(x2, wmat)

    # Back to NCHW: (B, 1, L, W).
    out = out3[:M].reshape(B, W, S * N)[:, :, :L]
    out = jnp.transpose(out, (0, 2, 1))[:, None, :, :]
    return out


# ---------------------------------------------------------------------------
# Pure-numpy reference (conv-transpose as explicit overlap-add)
# ---------------------------------------------------------------------------
def reference_np(x, weight):
    x = np.asarray(x, dtype=np.float32)
    w = np.asarray(weight, dtype=np.float32)[:, 0, :, 0]    # (N, filtlen)
    B, N, T, W = x.shape
    F = w.shape[1]
    L = (T - 1) * N + F
    out = np.zeros((B, 1, L, W), dtype=np.float32)
    for t in range(T):
        frame = np.einsum("bcw,cf->bfw", x[:, :, t, :], w)  # (B, F, W)
        out[:, 0, t * N:t * N + F, :] += frame
    return out


if __name__ == "__main__":
    # Small, MDCT-consistent shapes: N bins, filtlen = 2N, T frames, W=2 (stereo)
    N, filtlen = 8, 16
    B, T, W = 2, 8, 2

    key = jax.random.PRNGKey(0)
    x = jax.random.normal(key, (B, N, T, W), dtype=jnp.float32)
    weight = mdct_syn_init(N, filtlen)

    y = mdct_syn_stereo(x, weight)
    y = jax.block_until_ready(y)

    # Reference uses the same bf16-quantized inputs the kernel feeds the MXU
    # (accumulation is f32 in both), so tolerances stay tight.
    x_q = np.asarray(x.astype(jnp.bfloat16).astype(jnp.float32))
    w_q = np.asarray(weight.astype(jnp.bfloat16).astype(jnp.float32))
    y_ref = reference_np(x_q, w_q)

    assert y.shape == (B, 1, (T - 1) * N + filtlen, W), y.shape
    np.testing.assert_allclose(np.asarray(y), y_ref, rtol=2e-3, atol=2e-3)

    print("KERNEL_OK")
</pallas_src>

<mosaic_0001>
module attributes {stable_mosaic.version = 11 : i64} {
  func.func @mdct_syn_kernel(%arg0: i32, %arg1: memref<16x8xbf16, #tpu.memory_space<vmem>>, %arg2: memref<8x16xbf16, #tpu.memory_space<vmem>>, %arg3: memref<1x16x8xf32, #tpu.memory_space<vmem>>) attributes {dimension_semantics = [#tpu.dimension_semantics<parallel>], iteration_bounds = array<i64: 4>, scalar_prefetch = 0 : i64, scratch_operands = 0 : i64, tpu.core_type = #tpu.core_type<tc>, window_params = [{transform_indices = @transform_0, window_bounds = array<i64: 16, 8>}, {pipeline_mode = #tpu.pipeline_mode<synchronous>, transform_indices = @transform_1, window_bounds = array<i64: 8, 16>}, {transform_indices = @transform_2, window_bounds = array<i64: 1, 16, 8>}]} {
    %c0 = arith.constant 0 : index
    %c0_0 = arith.constant 0 : index
    %0 = vector.load %arg1[%c0, %c0_0] : memref<16x8xbf16, #tpu.memory_space<vmem>>, vector<16x8xbf16>
    %c0_1 = arith.constant 0 : index
    %c0_2 = arith.constant 0 : index
    %1 = vector.load %arg2[%c0_1, %c0_2] : memref<8x16xbf16, #tpu.memory_space<vmem>>, vector<8x16xbf16>
    %cst = arith.constant dense<0.000000e+00> : vector<16x16xf32>
    %2 = tpu.matmul %0, %1, %cst {dimension_numbers = #tpu.dot_dimension_numbers<[1], [0], [0], [1], [0, 0, 1, 1], [], []>} : vector<16x8xbf16>, vector<8x16xbf16>, vector<16x16xf32> -> vector<16x16xf32>
    %3 = vector.shape_cast %2 : vector<16x16xf32> to vector<1x16x16xf32>
    %4 = vector.extract_strided_slice %3 {offsets = [0, 0, 0], sizes = [1, 16, 8], strides = [1, 1, 1]} : vector<1x16x16xf32> to vector<1x16x8xf32>
    %5 = vector.extract_strided_slice %3 {offsets = [0, 0, 8], sizes = [1, 16, 8], strides = [1, 1, 1]} : vector<1x16x16xf32> to vector<1x16x8xf32>
    %c1_i32 = arith.constant 1 : i32
    %6 = tpu.dynamic_rotate %5 by %c1_i32 dim 1 : vector<1x16x8xf32>, i32 -> vector<1x16x8xf32>
    %7 = arith.addf %4, %6 : vector<1x16x8xf32>
    %c0_3 = arith.constant 0 : index
    %c0_4 = arith.constant 0 : index
    %c0_5 = arith.constant 0 : index
    %8 = vector.load %arg3[%c0_3, %c0_4, %c0_5] : memref<1x16x8xf32, #tpu.memory_space<vmem>>, vector<1x16x8xf32>
    tpu.vector_store %arg3[%c0_3, %c0_4, %c0_5], %7 {strides = array<i32>} : memref<1x16x8xf32, #tpu.memory_space<vmem>>, vector<1x16x8xf32>,
    return
  }
  func.func @transform_0(%arg0: i32) -> (i32, i32) {
    %c0_i32 = arith.constant 0 : i32
    %c0_i32_0 = arith.constant 0 : i32
    return %arg0, %c0_i32 : i32, i32
  }
  func.func @transform_1(%arg0: i32) -> (i32, i32) {
    %c0_i32 = arith.constant 0 : i32
    %c0_i32_0 = arith.constant 0 : i32
    %c0_i32_1 = arith.constant 0 : i32
    return %c0_i32, %c0_i32_0 : i32, i32
  }
  func.func @transform_2(%arg0: i32) -> (i32, i32, i32) {
    %c0_i32 = arith.constant 0 : i32
    %c0_i32_0 = arith.constant 0 : i32
    %c0_i32_1 = arith.constant 0 : i32
    return %arg0, %c0_i32, %c0_i32_0 : i32, i32, i32
  }
}

</mosaic_0001>

<bundles_post_ra>
// kernel: tpu_custom_call.1
= control target key start
LH: loop header
LB: loop body
LE: loop exit
PB: predicated region body
PF: predicated region fallthrough
CT: control target
= control target key end

     0   :  { %7 = vsyncpa [#allocation3], 0  ;;  %s798_s0 = inlined_call_operand.hbm [shape: bf16[64,8], index: 0, kind: input, shape index: {}]   ;;  %s799_s1 = inlined_call_operand.hbm [shape: bf16[8,16], index: 1, kind: input, shape index: {}]   ;;  %s800_s2 = inlined_call_operand.hbm [shape: f32[4,16,8], index: 2, kind: output, shape index: {}]  }
   0x1   :  { %9 = vsyncpa [#allocation3 + $0x1], 0 }
   0x2   :  { %10 = vsyncpa [#allocation6], 0 }
   0x3   :  { %11 = vsyncpa [#allocation4], 0 }
   0x4   :  { %13 = vsyncpa [#allocation4 + $0x1], 0  ;;  %s598_s9 = smov 0   ;;  %s600_s10 = smov 0  }
   0x5   :  { %s602_s11 = smov 0   ;;  %s604_s12 = smov 0  }
   0x6 LB: > { %s619_s13 = sadd.s32 4294967295, %s571_s12   ;;  %s350_s14 = sadd.s32 4294967294, %s571_s12   ;;  %s571_s12 = sphi %s604_s12, %s823_s12   ;;  %s567_s11 = sphi %s602_s11, %s822_s11   ;;  %s563_s10 = sphi %s600_s10, %s821_s10   ;;  %s559_s9 = sphi %s598_s9, %s820_s9  }
   0x7   : > { %s623_s15 = sadd.s32 1, %s571_s12   ;;  %s26_s16 = sadd.s32 1, %s567_s11 }
   0x8   : > { %s23_s17 = ssub.s32 %s571_s12, %s623_s15  ;;  %p33_p0 = scmp.ne.s32.totalorder %s567_s11, %s563_s10 }
   0x9   : > { %p24_p1 = scmp.eq.s32.totalorder %s23_s17, 0  ;;  %p34_p2 = scmp.eq.s32.totalorder %s571_s12, 0 }
   0xa   : > { %p39_p3 = scmp.ne.s32.totalorder %s563_s10, %s559_s9  ;;  %p801_p4 = scmp.eq.s32.totalorder %s619_s13, 0 }
   0xb   : > { %s635_s18 = scalar_select %p24_p1, %s567_s11, %s26_s16  }
   0xc   : > { %p637_p5 = por %p34_p2, %p33_p0  ;;  %p643_p6 = por %p801_p4, %p39_p3 }
   0xd   : > { %p84_p7 = scmp.eq.s32.totalorder %s619_s13, 3  ;;  %p90_p8 = scmp.eq.s32.totalorder %s350_s14, 3 }
   0xe   : > { %s807_s20 = scalar_select %p643_p6, 1, 0 }
   0xf   : > { %p351_p9 = scmp.ge.s32.totalorder %s571_s12, 1  ;;  %p97_p10 = scmp.lt.s32.totalorder %s571_s12, 5 }
  0x10   : > { %p650_p11 = por %p84_p7, %p33_p0  ;;  %p654_p12 = por %p90_p8, %p39_p3 }
  0x11   : > { %p658_p13 = pnand %p351_p9, %p97_p10  ;;  %s573_s24 = smov [#allocation5]  }
  0x12   : > { %s808_s21 = scalar_select %p650_p11, 1, 0 }
  0x13   : > { %s809_s22 = scalar_select %p654_p12, 1, 0 }
  0x14   : > { %s810_s23 = scalar_select %p658_p13, 1, 0 }
  0x15   : > { %p386_p1 = pneg %p658_p13  ;;  %s110_s25 = sshll.u32 %s573_s24, 4  ;;  %s111_s25 = int_to_ptr.vmem [resolvable:$true] %s110_s25 }
  0x16   : > { %p399_p2 = scmp.lt.s32.totalorder %s571_s12, 4  ;;  %s121_s27 = sand.u32 1, %s567_s11  }
  0x17   : > { %p667_p0 = pnand %p386_p1, %p801_p4  ;;  %s354_s29 = sshll.u32 %s121_s27, 3 }
  0x18   : > { %p674_p3 = pnand %p399_p2, %p637_p5  ;;  %s443_s4 = scalar_lea.hbm %s799_s1, 64 }
  0x19   : > { %p444_p7 = scmp.ne.s32.totalorder %s799_s1, %s443_s4  ;;  %p445_p8 = pneg %p667_p0 }
  0x1a   : > { %s812_s28 = scalar_select %p674_p3, 1, 0 }
  0x1b   : > { %p446_p9 = pnand %p445_p8, %p444_p7  ;;  %p450_p5 = scmp.lt.u32.totalorder %s443_s4, %s799_s1 }
  0x1d   : > { %p447_p10 = pneg %p446_p9 }
  0x1f   : > { %p452_p1 = pnand %p450_p5, %p447_p10 }
  0x21   : > { %455 = shalt.err (!%p452_p1)
}
  0x22   : > { %s456_s14 = scalar_lea.vmem %s111_s25, 64  ;;  %p464_p11 = scmp.lt.s32.totalorder %s111_s25, %s111_s25 }
  0x23   : > { %p457_p2 = scmp.ne.s32.totalorder %s111_s25, %s456_s14  ;;  %p465_p6 = scmp.lt.s32.totalorder %s456_s14, %s456_s14 }
  0x25   : > { %p459_p4 = pnand %p457_p2, %p445_p8  ;;  %p466_p13 = por %p465_p6, %p464_p11 }
  0x27   : > { %p460_p12 = pneg %p459_p4 }
  0x29   : > { %p467_p3 = pnand %p466_p13, %p460_p12 }
  0x2b   : > { %470 = shalt.err (!%p467_p3)
}
  0x2c   : > { %389 = dma.hbm_to_vmem [thread:$0]  (!%p667_p0), %s799_s1, 64, %s111_s25, [#allocation6]  }
  0x2d   : > { %s368_s19 = sshll.u32 %s571_s12, 7  ;;  %s125_s24 = scalar_lea.vmem [#allocation2], %s354_s29 }
  0x2e   : > { %s132_s30 = sshll.u32 %s125_s24, 4  ;;  %s698_s5 = scalar_lea.hbm %s798_s0, %s368_s19  ;;  %s700_s30 = int_to_ptr.vmem [resolvable:$true] %s132_s30 }
  0x2f   : > { %s702_s26 = scalar_lea.sflag [#allocation3], %s121_s27  ;;  %s471_s6 = scalar_lea.hbm %s698_s5, 128 }
  0x30   : > { %p472_p4 = scmp.ne.s32.totalorder %s698_s5, %s471_s6  ;;  %p813_p6 = scmp.ne.s32.totalorder %s812_s28, 0 }
  0x31   : > { %s476_s7 = scalar_lea.hbm %s798_s0, 512  ;;  %p477_p0 = scmp.lt.u32.totalorder %s698_s5, %s798_s0 }
  0x32   : > { %p473_p11 = pneg %p813_p6  ;;  %p478_p3 = scmp.lt.u32.totalorder %s476_s7, %s471_s6 }
  0x33   : > { %p480_p8 = scmp.lt.u32.totalorder %s471_s6, %s698_s5 }
  0x34   : > { %p474_p12 = pnand %p473_p11, %p472_p4  ;;  %p479_p7 = por %p478_p3, %p477_p0 }
  0x36   : > { %p475_p13 = pneg %p474_p12  ;;  %p481_p9 = por %p480_p8, %p479_p7 }
  0x38   : > { %p482_p10 = pnand %p481_p9, %p475_p13 }
  0x3a   : > { %485 = shalt.err (!%p482_p10)
}
  0x3b   : > { %s486_s27 = scalar_lea.vmem %s700_s30, 128  ;;  %s574_s16 = smov [#allocation2]  }
  0x3c   : > { %p487_p5 = scmp.ne.s32.totalorder %s700_s30, %s486_s27  ;;  %s491_s17 = sshll.u32 %s574_s16, 4  ;;  %s492_s17 = int_to_ptr.vmem [resolvable:$false] %s491_s17 }
  0x3d   : > { %s493_s19 = scalar_lea.vmem %s492_s17, 256  ;;  %p494_p4 = scmp.lt.s32.totalorder %s700_s30, %s492_s17 }
  0x3e   : > { %p489_p1 = pnand %p487_p5, %p473_p11  ;;  %p495_p12 = scmp.lt.s32.totalorder %s493_s19, %s486_s27 }
  0x40   : > { %p490_p2 = pneg %p489_p1  ;;  %p496_p0 = por %p495_p12, %p494_p4 }
  0x42   : > { %p497_p3 = pnand %p496_p0, %p490_p2 }
  0x44   : > { %500 = shalt.err (!%p497_p3)
}
  0x45   : > { %s575_s24 = smov 64   ;;  %s576_s3 = smov 4  }
  0x46   : > { %393 = dma.hbm_to_vmem [thread:$0]  (!%p813_p6), %s698_s5, 128, %s700_s30, %s702_s26, %s575_s24, %s575_s24, %s576_s3  }
  0x47   : > { %p814_p11 = scmp.ne.s32.totalorder %s810_s23, 0 }
  0x48   : > { %s733_s4 = sand.u32 (!%p814_p11), 1, %s563_s10   ;;  %p815_p13 = scmp.ne.s32.totalorder (!%p814_p11), %s807_s20, 0 }
  0x49   : > { %144 = sbr.rel (%p814_p11) target bundleno = 440 (0x1b8), region = 28  ;;  %s358_s6 = sshll.u32 (!%p814_p11), %s733_s4, 3 }
  0x4a   : > { %s147_s25 = scalar_lea.sflag (!%p814_p11), [#allocation3], %s733_s4  ;;  %s150_s29 = scalar_lea.vmem (!%p814_p11), [#allocation2], %s358_s6 }
  0x50   : > { %546 = dma.done.wait (%p815_p13), %s147_s25, 128  }
  0x51   : > { %548 = vsyncadd (%p815_p13), %s147_s25, 4294967168  ;;  %p816_p7 = scmp.eq.s32.totalorder %s619_s13, 0 }
  0x53   : > { %550 = dma.done.wait (%p816_p7), [#allocation6], 64   ;;  %p817_p6 = pmov %p816_p7 }
  0x54   : > { %v577_v0 = vmov 0.0   ;;  %vm578_vm0 = vmmov 0   ;;  %vm189_vm1 = vcmask 1043456   ;;  %v179_v1 = vld [vmem:[#allocation5] sm:$0xf]  ;;  %v442_v3 = vld [vmem:[%s150_s29] sm:$0xff]   ;;  %v244_v8 = vlaneseq }
  0x55   : > { %552 = vsyncadd (%p817_p6), [#allocation6], 4294967232  ;;  %372 = vmatprep.subr.bf16.mxu0 %v577_v0  ;;  %374 = vmatprep.mubr.msk.bf16.mxu0 %vm578_vm0, %v577_v0  ;;  %v191_v2 = vsel %vm189_vm1, %v179_v1, 0  ;;  %vm185_vm2 = vcmask 64512   ;;  %s579_s20 = smov 120   ;;  %s360_s23 = sshll.u32 %s733_s4, 4 }
  0x56   : > { %373 = vmatpush3.bf16.msra.mxu0 %v191_v2  ;;  %v245_v10 = vshrl.u32 %v244_v8, 7  ;;  %s369_s28 = sshll.u32 %s619_s13, 8  ;;  %s174_s30 = scalar_lea.vmem [#allocation7], %s360_s23 }
  0x57   : > { %s267_s5 = sshll.u32 %s174_s30, 4  ;;  %s751_s8 = scalar_lea.hbm %s800_s2, %s369_s28  ;;  %s753_s5 = int_to_ptr.vmem [resolvable:$true] %s267_s5 }
  0x58   : > { %vm246_vm3 = vcmp.lt.s32.totalorder %v245_v10, 1  ;;  %s254_s13 = scalar_lea.sflag [#allocation4], %s733_s4  ;;  %s501_s14 = scalar_lea.vmem %s753_s5, 256 }
  0x59   : > { %375 = vmatmul.mubr.msk.bf16.vlgmr.msra.gmra.mrb[0].mxu0 %vm185_vm2, %v442_v3  ;;  %p502_p8 = scmp.ne.s32.totalorder %s753_s5, %s501_s14  ;;  %p818_p9 = scmp.ne.s32.totalorder %s808_s21, 0 }
  0x5a   : > { %s580_s27 = smov [#allocation7]  }
  0x5b   : > { %p503_p10 = pnand %p502_p8, %p818_p9  ;;  %s505_s16 = sshll.u32 %s580_s27, 4  ;;  %s506_s16 = int_to_ptr.vmem [resolvable:$false] %s505_s16 }
  0x5c   : > { %s507_s17 = scalar_lea.vmem %s506_s16, 512  ;;  %p508_p1 = scmp.lt.s32.totalorder %s753_s5, %s506_s16 }
  0x5d   : > { %p504_p5 = pneg %p503_p10  ;;  %p509_p2 = scmp.lt.s32.totalorder %s507_s17, %s501_s14 }
  0x5f   : > { %p510_p4 = por %p509_p2, %p508_p1 }
  0x61   : > { %p511_p12 = pnand %p510_p4, %p504_p5 }
 0x12c   : > { %v227_v4 = vpop.f32.mrb[0].mxu0 }
 0x12d   : > { %236 = vrot.lane.b32.xlu0 %v227_v4, %s579_s20  ;;  %v376_v5 = vpop.f32.mrb[1].mxu0 }
 0x12e   : > { %v230_v6 = vpop.f32.mrb[2].mxu0 }
 0x12f   : > { %v377_v7 = vpop.f32.mrb[3].mxu0 }
 0x131   : > { %238 = vrot.lane.b32.xlu0 %v230_v6, %s579_s20 }
 0x19f   : > { %v237_v9 = vpop.permute.xlu0 %236 }
 0x1a0   : > { %v242_v12 = vrot.slane %v237_v9, 7 }
 0x1a3   : > { %v239_v11 = vpop.permute.xlu0 %238 }
 0x1a4   : > { %v243_v13 = vrot.slane %v239_v11, 7 }
 0x1a6   : > { %v247_v14 = vsel %vm246_vm3, %v242_v12, %v243_v13  ;;  %v248_v15 = vsel %vm246_vm3, %v243_v13, %v242_v12 }
 0x1a7   : > { %v249_v16 = vadd.f32 %v248_v15, %v227_v4  ;;  %v250_v17 = vadd.f32 %v247_v14, %v230_v6 }
 0x1a9   : > { %251 = vst.msk [vmem:[%s174_s30] sm:$0xff] %vm185_vm2, %v249_v16  ;;  %252 = vst.msk [vmem:[%s174_s30 + $0x8] sm:$0xff] %vm185_vm2, %v250_v17 }
 0x1aa   : > { %514 = shalt.err (!%p511_p12)
}
 0x1ab   : > { %s515_s19 = scalar_lea.hbm %s751_s8, 256  ;;  %s519_s6 = scalar_lea.hbm %s800_s2, 1024 }
 0x1ac   : > { %p516_p0 = scmp.ne.s32.totalorder %s751_s8, %s515_s19  ;;  %p520_p13 = scmp.lt.u32.totalorder %s751_s8, %s800_s2 }
 0x1ad   : > { %p521_p7 = scmp.lt.u32.totalorder %s519_s6, %s515_s19  ;;  %p523_p8 = scmp.lt.u32.totalorder %s515_s19, %s751_s8 }
 0x1ae   : > { %p517_p3 = pnand %p516_p0, %p818_p9 }
 0x1af   : > { %p522_p6 = por %p521_p7, %p520_p13 }
 0x1b0   : > { %p518_p11 = pneg %p517_p3 }
 0x1b1   : > { %p524_p10 = por %p523_p8, %p522_p6 }
 0x1b3   : > { %p525_p5 = pnand %p524_p10, %p518_p11 }
 0x1b5   : > { %528 = shalt.err (!%p525_p5)
}
 0x1b6   : > { %s581_s20 = smov 128   ;;  %s582_s23 = smov 8  }
 0x1b7   : > { %384 = dma.vmem_to_hbm [thread:$0]  (%p818_p9), %s753_s5, 256, %s751_s8, %s254_s13, %s581_s20, %s581_s20, %s582_s23  }
 0x1b8 PF: > { %p401_p1 = scmp.ge.s32.totalorder %s571_s12, 2  ;;  %s282_s28 = sand.u32 1, %s559_s9  }
 0x1b9   : > { %p819_p2 = scmp.ne.s32.totalorder %s809_s22, 0  ;;  %s283_s30 = scalar_lea.sflag [#allocation4], %s282_s28 }
 0x1bb   : > { %p395_p4 = pnand %p401_p1, %p819_p2 }
 0x1bd   : > { %554 = dma.done.wait (!%p395_p4), %s283_s30, 256  }
 0x1be   : > { %556 = vsyncadd (!%p395_p4), %s283_s30, 4294967040  ;;  %p16_p12 = scmp.ge.s32.totalorder %s623_s15, 6   ;;  %s820_s9 = smov %s563_s10 }
 0x1bf   : > { %s821_s10 = smov %s567_s11  ;;  %s822_s11 = smov %s635_s18 }
 0x1c0   : > { %s823_s12 = smov %s623_s15  ;;  %18 = sbr.rel (!%p16_p12) target bundleno = 6 (0x6), region = 77 }
 0x1c7   :  { %288 = vsyncpa [#allocation3], 1 }
 0x1c8   :  { %290 = vsyncpa [#allocation3 + $0x1], 1 }
 0x1c9   :  { %291 = vsyncpa [#allocation6], 1 }
 0x1ca   :  { %292 = vsyncpa [#allocation4], 1 }
 0x1cb   :  { %294 = vsyncpa [#allocation4 + $0x1], 1 }

</bundles_post_ra>
